<compile_context>
chip_gen: v5e
topology: v5e:2x2
jax: 0.10.0
libtpu: 0.0.40
codegen_flags: <defaults>
</compile_context>

<pallas_src>
import jax
import jax.numpy as jnp
from jax import lax
from jax.experimental import pallas as pl
from jax.experimental.pallas import tpu as pltpu


def cn_kernel(x_ref,
              w1_ref, b1_ref,
              w2_ref, b2_ref,
              w3_ref, b3_ref,
              w4_ref, b4_ref,
              o_ref):
    # x_ref: (batch_tile, nCIP)  -- batch on sublanes, as stored in HBM.
    # w_k:   (out_k, in_k)       -- PyTorch nn.Linear layout.
    # b_k:   (out_k, 1)          -- broadcasts over the lane (batch) axis.
    # o_ref: (1, batch_tile)     -- lane-dense output slab.
    x = x_ref[...]

    # Layer 1: contract x's feature axis directly (A @ B^T on the MXU) so the
    # large batch dim lands on the MXU N/lane axis; f32 accumulation.
    h = lax.dot_general(
        w1_ref[...], x,
        dimension_numbers=(((1,), (1,)), ((), ())),
        preferred_element_type=jnp.float32,
    )                                                   # (8, batch_tile) f32
    h = jnp.maximum(h + b1_ref[...], 0.0)

    h = jnp.dot(w2_ref[...], h, preferred_element_type=jnp.float32) + b2_ref[...]
    h = jnp.maximum(h, 0.0)                             # (16, batch_tile)

    h = jnp.dot(w3_ref[...], h, preferred_element_type=jnp.float32) + b3_ref[...]
    h = jnp.maximum(h, 0.0)                             # (16, batch_tile)

    h = jnp.dot(w4_ref[...], h, preferred_element_type=jnp.float32) + b4_ref[...]

    o_ref[...] = h.astype(o_ref.dtype)                  # (1, batch_tile) full-lane store


def _pick_batch_tile(B, nCIP, x_itemsize, vmem_budget_bytes):
    """Largest 128-aligned power-of-two tile that (a) yields several grid steps
    (pipelining + dual-TC sharding on v7x) and (b) keeps the double-buffered x
    tile + output tile + params under a conservative scoped-VMEM budget
    (v5e default 16 MiB; v6e/v7x 32 MiB)."""
    tile = int(min(2048, max(128, pl.next_power_of_2(pl.cdiv(B, 8)))))

    def vmem_bytes(t):
        x_tiles = 2 * t * max(nCIP, 128) * x_itemsize   # double-buffered input (lane-padded)
        out_tiles = 2 * t * 4                           # double-buffered (1, t) f32 output
        params = 64 * 1024                              # tiny weights/biases + slack
        return x_tiles + out_tiles + params

    while tile > 128 and vmem_bytes(tile) > vmem_budget_bytes:
        tile //= 2
    return tile


def cn_forward(x, params, *, batch_tile=None, compute_dtype=None,
               vmem_budget_bytes=12 * 1024 * 1024):
    """Forward pass of CN. x: (B, nCIP) f32. params: w{k} (out,in), b{k} (out,1)."""
    B, nCIP = x.shape

    w1, b1 = params["w1"], params["b1"]   # (8, nCIP), (8, 1)
    w2, b2 = params["w2"], params["b2"]   # (16, 8),   (16, 1)
    w3, b3 = params["w3"], params["b3"]   # (16, 16),  (16, 1)
    w4, b4 = params["w4"], params["b4"]   # (1, 16),   (1, 1)

    if compute_dtype is not None:
        # Halve the dominant HBM stream (x); f32 accumulation stays in-kernel.
        x = x.astype(compute_dtype)
        w1 = w1.astype(compute_dtype)

    if batch_tile is None:
        batch_tile = _pick_batch_tile(B, nCIP, x.dtype.itemsize, vmem_budget_bytes)
    assert batch_tile % 128 == 0, "batch_tile must be lane-aligned (multiple of 128)"

    # Pad the batch so it divides evenly into tiles; padded rows are sliced off.
    Bp = pl.cdiv(B, batch_tile) * batch_tile
    if Bp != B:
        x = jnp.pad(x, ((0, Bp - B), (0, 0)))

    grid = (Bp // batch_tile,)

    def rep(shape):   # full-array block, replicated across the batch grid axis
        return pl.BlockSpec(shape, lambda i: (0, 0))

    yT = pl.pallas_call(
        cn_kernel,
        out_shape=jax.ShapeDtypeStruct((1, Bp), jnp.float32),
        grid=grid,
        in_specs=[
            pl.BlockSpec((batch_tile, nCIP), lambda i: (i, 0)),
            rep(w1.shape), rep(b1.shape),
            rep(w2.shape), rep(b2.shape),
            rep(w3.shape), rep(b3.shape),
            rep(w4.shape), rep(b4.shape),
        ],
        out_specs=pl.BlockSpec((1, batch_tile), lambda i: (0, i)),
        compiler_params=pltpu.CompilerParams(
            dimension_semantics=("parallel",),   # batch tiles shard across TCs on v7x
        ),
    )(x, w1, b1, w2, b2, w3, b3, w4, b4)

    # (1, Bp) row-major holds the same element order as (Bp, 1): pure layout plumbing.
    return yT.reshape(Bp, 1)[:B]


def init_params(key, nCIP):
    """nn.Linear default init U(-1/sqrt(fan_in), 1/sqrt(fan_in)), PyTorch (out, in) layout."""
    dims = [(nCIP, 8), (8, 16), (16, 16), (16, 1)]
    params = {}
    for idx, (fan_in, fan_out) in enumerate(dims, start=1):
        key, kw, kb = jax.random.split(key, 3)
        bound = float(fan_in) ** -0.5
        params[f"w{idx}"] = jax.random.uniform(
            kw, (fan_out, fan_in), jnp.float32, -bound, bound)
        params[f"b{idx}"] = jax.random.uniform(
            kb, (fan_out, 1), jnp.float32, -bound, bound)
    return params


def cn_reference(x, params):
    h = x
    for i in (1, 2, 3):
        h = jnp.maximum(h @ params[f"w{i}"].T + params[f"b{i}"].T, 0.0)
    return h @ params["w4"].T + params["b4"].T


if __name__ == "__main__":
    nCIP = 32
    B = 1024   # -> 8 grid steps with the default 128-row tile

    key = jax.random.PRNGKey(0)
    key, kx = jax.random.split(key)
    x = jax.random.normal(kx, (B, nCIP), jnp.float32)
    params = init_params(key, nCIP)

    ref = cn_reference(x, params)

    # f32 path: near-exact match against the pure-JAX reference.
    out_f32 = jax.block_until_ready(cn_forward(x, params))
    assert out_f32.shape == (B, 1), out_f32.shape
    assert jnp.allclose(out_f32, ref, atol=2e-4, rtol=2e-4)

    # bf16 x / layer-1 weights (halves the dominant HBM traffic), f32 accumulate.
    out_bf16 = jax.block_until_ready(cn_forward(x, params, compute_dtype=jnp.bfloat16))
    assert out_bf16.shape == (B, 1), out_bf16.shape
    assert jnp.allclose(out_bf16, ref, atol=5e-2, rtol=5e-2)

    print("KERNEL_OK")
</pallas_src>

<mosaic_0001>
module attributes {stable_mosaic.version = 11 : i64} {
  func.func @cn_kernel(%arg0: i32, %arg1: memref<128x32xf32, #tpu.memory_space<vmem>>, %arg2: memref<8x32xf32, #tpu.memory_space<vmem>>, %arg3: memref<8x1xf32, #tpu.memory_space<vmem>>, %arg4: memref<16x8xf32, #tpu.memory_space<vmem>>, %arg5: memref<16x1xf32, #tpu.memory_space<vmem>>, %arg6: memref<16x16xf32, #tpu.memory_space<vmem>>, %arg7: memref<16x1xf32, #tpu.memory_space<vmem>>, %arg8: memref<1x16xf32, #tpu.memory_space<vmem>>, %arg9: memref<1x1xf32, #tpu.memory_space<vmem>>, %arg10: memref<1x128xf32, #tpu.memory_space<vmem>>) attributes {dimension_semantics = [#tpu.dimension_semantics<parallel>], iteration_bounds = array<i64: 8>, scalar_prefetch = 0 : i64, scratch_operands = 0 : i64, tpu.core_type = #tpu.core_type<tc>, window_params = [{transform_indices = @transform_0, window_bounds = array<i64: 128, 32>}, {pipeline_mode = #tpu.pipeline_mode<synchronous>, transform_indices = @transform_1, window_bounds = array<i64: 8, 32>}, {pipeline_mode = #tpu.pipeline_mode<synchronous>, transform_indices = @transform_2, window_bounds = array<i64: 8, 1>}, {pipeline_mode = #tpu.pipeline_mode<synchronous>, transform_indices = @transform_3, window_bounds = array<i64: 16, 8>}, {pipeline_mode = #tpu.pipeline_mode<synchronous>, transform_indices = @transform_4, window_bounds = array<i64: 16, 1>}, {pipeline_mode = #tpu.pipeline_mode<synchronous>, transform_indices = @transform_5, window_bounds = array<i64: 16, 16>}, {pipeline_mode = #tpu.pipeline_mode<synchronous>, transform_indices = @transform_6, window_bounds = array<i64: 16, 1>}, {pipeline_mode = #tpu.pipeline_mode<synchronous>, transform_indices = @transform_7, window_bounds = array<i64: 1, 16>}, {pipeline_mode = #tpu.pipeline_mode<synchronous>, transform_indices = @transform_8, window_bounds = array<i64: 1, 1>}, {transform_indices = @transform_9, window_bounds = array<i64: 1, 128>}]} {
    %c0 = arith.constant 0 : index
    %c0_0 = arith.constant 0 : index
    %0 = vector.load %arg1[%c0, %c0_0] : memref<128x32xf32, #tpu.memory_space<vmem>>, vector<128x32xf32>
    %c0_1 = arith.constant 0 : index
    %c0_2 = arith.constant 0 : index
    %1 = vector.load %arg2[%c0_1, %c0_2] : memref<8x32xf32, #tpu.memory_space<vmem>>, vector<8x32xf32>
    %cst = arith.constant dense<0.000000e+00> : vector<8x128xf32>
    %2 = tpu.matmul %1, %0, %cst {dimension_numbers = #tpu.dot_dimension_numbers<[1], [1], [0], [0], [0, 0, 1, 0], [], []>} : vector<8x32xf32>, vector<128x32xf32>, vector<8x128xf32> -> vector<8x128xf32>
    %c0_3 = arith.constant 0 : index
    %c0_4 = arith.constant 0 : index
    %3 = vector.load %arg3[%c0_3, %c0_4] : memref<8x1xf32, #tpu.memory_space<vmem>>, vector<8x1xf32>
    %4 = vector.broadcast %3 : vector<8x1xf32> to vector<8x128xf32>
    %5 = arith.addf %2, %4 : vector<8x128xf32>
    %cst_5 = arith.constant 0.000000e+00 : f32
    %6 = vector.broadcast %cst_5 : f32 to vector<8x128xf32>
    %7 = arith.maximumf %5, %6 : vector<8x128xf32>
    %c0_6 = arith.constant 0 : index
    %c0_7 = arith.constant 0 : index
    %8 = vector.load %arg4[%c0_6, %c0_7] : memref<16x8xf32, #tpu.memory_space<vmem>>, vector<16x8xf32>
    %cst_8 = arith.constant dense<0.000000e+00> : vector<16x128xf32>
    %9 = tpu.matmul %8, %7, %cst_8 {dimension_numbers = #tpu.dot_dimension_numbers<[1], [0], [0], [1], [0, 0, 1, 1], [], []>} : vector<16x8xf32>, vector<8x128xf32>, vector<16x128xf32> -> vector<16x128xf32>
    %c0_9 = arith.constant 0 : index
    %c0_10 = arith.constant 0 : index
    %10 = vector.load %arg5[%c0_9, %c0_10] : memref<16x1xf32, #tpu.memory_space<vmem>>, vector<16x1xf32>
    %11 = vector.broadcast %10 : vector<16x1xf32> to vector<16x128xf32>
    %12 = arith.addf %9, %11 : vector<16x128xf32>
    %cst_11 = arith.constant 0.000000e+00 : f32
    %13 = vector.broadcast %cst_11 : f32 to vector<16x128xf32>
    %14 = arith.maximumf %12, %13 : vector<16x128xf32>
    %c0_12 = arith.constant 0 : index
    %c0_13 = arith.constant 0 : index
    %15 = vector.load %arg6[%c0_12, %c0_13] : memref<16x16xf32, #tpu.memory_space<vmem>>, vector<16x16xf32>
    %cst_14 = arith.constant dense<0.000000e+00> : vector<16x128xf32>
    %16 = tpu.matmul %15, %14, %cst_14 {dimension_numbers = #tpu.dot_dimension_numbers<[1], [0], [0], [1], [0, 0, 1, 1], [], []>} : vector<16x16xf32>, vector<16x128xf32>, vector<16x128xf32> -> vector<16x128xf32>
    %c0_15 = arith.constant 0 : index
    %c0_16 = arith.constant 0 : index
    %17 = vector.load %arg7[%c0_15, %c0_16] : memref<16x1xf32, #tpu.memory_space<vmem>>, vector<16x1xf32>
    %18 = vector.broadcast %17 : vector<16x1xf32> to vector<16x128xf32>
    %19 = arith.addf %16, %18 : vector<16x128xf32>
    %cst_17 = arith.constant 0.000000e+00 : f32
    %20 = vector.broadcast %cst_17 : f32 to vector<16x128xf32>
    %21 = arith.maximumf %19, %20 : vector<16x128xf32>
    %c0_18 = arith.constant 0 : index
    %c0_19 = arith.constant 0 : index
    %22 = vector.load %arg8[%c0_18, %c0_19] : memref<1x16xf32, #tpu.memory_space<vmem>>, vector<1x16xf32>
    %cst_20 = arith.constant dense<0.000000e+00> : vector<1x128xf32>
    %23 = tpu.matmul %22, %21, %cst_20 {dimension_numbers = #tpu.dot_dimension_numbers<[1], [0], [0], [1], [0, 0, 1, 1], [], []>} : vector<1x16xf32>, vector<16x128xf32>, vector<1x128xf32> -> vector<1x128xf32>
    %c0_21 = arith.constant 0 : index
    %c0_22 = arith.constant 0 : index
    %24 = vector.load %arg9[%c0_21, %c0_22] : memref<1x1xf32, #tpu.memory_space<vmem>>, vector<1x1xf32>
    %25 = vector.broadcast %24 : vector<1x1xf32> to vector<1x128xf32>
    %26 = arith.addf %23, %25 : vector<1x128xf32>
    %c0_23 = arith.constant 0 : index
    %c0_24 = arith.constant 0 : index
    %27 = vector.load %arg10[%c0_23, %c0_24] : memref<1x128xf32, #tpu.memory_space<vmem>>, vector<1x128xf32>
    tpu.vector_store %arg10[%c0_23, %c0_24], %26 {strides = array<i32>} : memref<1x128xf32, #tpu.memory_space<vmem>>, vector<1x128xf32>,
    return
  }
  func.func @transform_0(%arg0: i32) -> (i32, i32) {
    %c0_i32 = arith.constant 0 : i32
    %c0_i32_0 = arith.constant 0 : i32
    return %arg0, %c0_i32 : i32, i32
  }
  func.func @transform_1(%arg0: i32) -> (i32, i32) {
    %c0_i32 = arith.constant 0 : i32
    %c0_i32_0 = arith.constant 0 : i32
    %c0_i32_1 = arith.constant 0 : i32
    return %c0_i32, %c0_i32_0 : i32, i32
  }
  func.func @transform_2(%arg0: i32) -> (i32, i32) {
    %c0_i32 = arith.constant 0 : i32
    %c0_i32_0 = arith.constant 0 : i32
    %c0_i32_1 = arith.constant 0 : i32
    return %c0_i32, %c0_i32_0 : i32, i32
  }
  func.func @transform_3(%arg0: i32) -> (i32, i32) {
    %c0_i32 = arith.constant 0 : i32
    %c0_i32_0 = arith.constant 0 : i32
    %c0_i32_1 = arith.constant 0 : i32
    return %c0_i32, %c0_i32_0 : i32, i32
  }
  func.func @transform_4(%arg0: i32) -> (i32, i32) {
    %c0_i32 = arith.constant 0 : i32
    %c0_i32_0 = arith.constant 0 : i32
    %c0_i32_1 = arith.constant 0 : i32
    return %c0_i32, %c0_i32_0 : i32, i32
  }
  func.func @transform_5(%arg0: i32) -> (i32, i32) {
    %c0_i32 = arith.constant 0 : i32
    %c0_i32_0 = arith.constant 0 : i32
    %c0_i32_1 = arith.constant 0 : i32
    return %c0_i32, %c0_i32_0 : i32, i32
  }
  func.func @transform_6(%arg0: i32) -> (i32, i32) {
    %c0_i32 = arith.constant 0 : i32
    %c0_i32_0 = arith.constant 0 : i32
    %c0_i32_1 = arith.constant 0 : i32
    return %c0_i32, %c0_i32_0 : i32, i32
  }
  func.func @transform_7(%arg0: i32) -> (i32, i32) {
    %c0_i32 = arith.constant 0 : i32
    %c0_i32_0 = arith.constant 0 : i32
    %c0_i32_1 = arith.constant 0 : i32
    return %c0_i32, %c0_i32_0 : i32, i32
  }
  func.func @transform_8(%arg0: i32) -> (i32, i32) {
    %c0_i32 = arith.constant 0 : i32
    %c0_i32_0 = arith.constant 0 : i32
    %c0_i32_1 = arith.constant 0 : i32
    return %c0_i32, %c0_i32_0 : i32, i32
  }
  func.func @transform_9(%arg0: i32) -> (i32, i32) {
    %c0_i32 = arith.constant 0 : i32
    %c0_i32_0 = arith.constant 0 : i32
    return %c0_i32, %arg0 : i32, i32
  }
}

</mosaic_0001>

<bundles_post_ra>
// kernel: tpu_custom_call.1
= control target key start
LH: loop header
LB: loop body
LE: loop exit
PB: predicated region body
PF: predicated region fallthrough
CT: control target
= control target key end

     0   :  { %s968_s0 = inlined_call_operand.vmem [shape: f32[1024,32], index: 0, kind: input, shape index: {}]   ;;  %s969_s1 = inlined_call_operand.vmem [shape: f32[8,32], index: 1, kind: input, shape index: {}]   ;;  %s970_s2 = inlined_call_operand.vmem [shape: f32[8,1], index: 2, kind: input, shape index: {}]   ;;  %s971_s3 = inlined_call_operand.vmem [shape: f32[16,8], index: 3, kind: input, shape index: {}]   ;;  %s972_s4 = inlined_call_operand.vmem [shape: f32[16,1], index: 4, kind: input, shape index: {}]   ;;  %s973_s5 = inlined_call_operand.vmem [shape: f32[16,16], index: 5, kind: input, shape index: {}]   ;;  %s974_s6 = inlined_call_operand.vmem [shape: f32[16,1], index: 6, kind: input, shape index: {}]   ;;  %s975_s7 = inlined_call_operand.vmem [shape: f32[1,16], index: 7, kind: input, shape index: {}]   ;;  %s976_s8 = inlined_call_operand.<no memory space> [shape: f32[1,1], index: 8, kind: input, shape index: {}]   ;;  %s977_s9 = inlined_call_operand.hbm [shape: f32[1,1024], index: 9, kind: output, shape index: {}]  }
   0x1   :  { %v14_v0 = vstv %s976_s8 }
   0x2   :  { %15 = vst [vmem:[#allocation2] sm:$0x1] %v14_v0 }
   0x3   :  { %16 = vsyncpa [#allocation4], 0 }
   0x4   :  { %18 = vsyncpa [#allocation4 + $0x1], 0  ;;  %s813_s11 = smov 0   ;;  %s815_s12 = smov 0  }
   0x5   :  { %s817_s13 = smov 0   ;;  %s819_s14 = smov 0  }
   0x6 LB: > { %s834_s8 = sadd.s32 4294967295, %s757_s14   ;;  %s622_s15 = sadd.s32 4294967294, %s757_s14   ;;  %s757_s14 = sphi %s819_s14, %s983_s14   ;;  %s753_s13 = sphi %s817_s13, %s982_s13   ;;  %s749_s12 = sphi %s815_s12, %s981_s12   ;;  %s745_s11 = sphi %s813_s11, %s980_s11  }
   0x7   : > { %s838_s16 = sadd.s32 1, %s757_s14   ;;  %s225_s17 = sadd.s32 1, %s753_s13 }
   0x8   : > { %s222_s18 = ssub.s32 %s757_s14, %s838_s16  ;;  %p235_p0 = scmp.ne.s32.totalorder %s753_s13, %s749_s12 }
   0x9   : > { %p223_p1 = scmp.eq.s32.totalorder %s222_s18, 0  ;;  %p236_p2 = scmp.eq.s32.totalorder %s834_s8, 7 }
   0xa   : > { %p241_p3 = scmp.ne.s32.totalorder %s749_s12, %s745_s11  ;;  %p242_p4 = scmp.eq.s32.totalorder %s622_s15, 7 }
   0xb   : > { %s849_s19 = scalar_select %p223_p1, %s753_s13, %s225_s17  }
   0xc   : > { %p851_p5 = por %p236_p2, %p235_p0  ;;  %p855_p6 = por %p242_p4, %p241_p3 }
   0xd   : > { %p625_p7 = scmp.ge.s32.totalorder %s757_s14, 1  ;;  %p293_p8 = scmp.lt.s32.totalorder %s757_s14, 9 }
   0xf   : > { %p294_p9 = pnand %p625_p7, %p293_p8 }
  0x10   : > { %s626_s22 = sshll.u32 (!%p294_p9), %s834_s8, 4  ;;  %s715_s18 = scalar_lea.hbm (!%p294_p9), %s977_s9, 8 }
  0x11   : > { %297 = sbr.rel (%p294_p9) target bundleno = 645 (0x285), region = 56  ;;  %p329_p10 = scmp.lt.s32.totalorder (!%p294_p9), %s626_s22, 127 }
  0x16   : > { %s985_s22 = smov (!%p329_p10, %s626_s22), 127  ;;  %vm357_vm0 = vcmask 261120   ;;  %v351_v10 = vld [vmem:[%s970_s2] sm:$0xff]  ;;  %v759_v11 = vmov 0   ;;  %v433_v14 = vld [vmem:[%s972_s4 + $0x8] sm:$0xff]  ;;  %vm444_vm1 = vcmask 64512  }
  0x17   : > { %s627_s23 = sshll.u32 %s985_s22, 3  ;;  %692 = vset.pattern.permute.xlu0 %v759_v11  ;;  %693 = vset.pattern.permute.xlu1 %v759_v11  ;;  %v350_v20 = vld [vmem:[%s969_s1] sm:$0xff]  ;;  %v479_v22 = vld [vmem:[%s974_s6 + $0x8] sm:$0xff]  ;;  %vm490_vm2 = vcmask 130048  }
  0x18   : > { %s865_s26 = scalar_lea.vmem %s968_s0, %s627_s23  ;;  %354 = vperm.xlu0 %692, %v351_v10   ;;  %694 = vset.pattern.permute.xlu2 %v759_v11  ;;  %v432_v21 = vld [vmem:[%s972_s4] sm:$0xff]  ;;  %v431_v28 = vld [vmem:[%s971_s3 + $0x8] sm:$0xff]  ;;  %s326_s23 = sand.u32 1, %s749_s12  }
  0x19   : > { %v349_v1 = vld [vmem:[%s865_s26 + $0x78] sm:$0xff]  ;;  %v348_v2 = vld [vmem:[%s865_s26 + $0x70] sm:$0xff]  ;;  %v347_v3 = vld [vmem:[%s865_s26 + $0x68] sm:$0xff]  ;;  %436 = vperm.xlu1 %693, %v432_v21   ;;  %s327_s27 = scalar_lea.vmem [#allocation3], %s326_s23  ;;  %s555_s30 = scalar_lea.sflag [#allocation4], %s326_s23 }
  0x1a   : > { %628 = vmatpush.xpose.msk.msra.mxu0 %vm357_vm0, %v349_v1  ;;  %v346_v4 = vld [vmem:[%s865_s26 + $0x60] sm:$0xff]  ;;  %v345_v5 = vld [vmem:[%s865_s26 + $0x58] sm:$0xff]  ;;  %v344_v6 = vld [vmem:[%s865_s26 + $0x50] sm:$0xff]  ;;  %s565_s28 = sshll.u32 %s327_s27, 4  ;;  %s566_s28 = int_to_ptr.vmem [resolvable:$true] %s565_s28 }
  0x1b   : > { %v343_v7 = vld [vmem:[%s865_s26 + $0x48] sm:$0xff]  ;;  %v342_v8 = vld [vmem:[%s865_s26 + $0x40] sm:$0xff]  ;;  %v341_v9 = vld [vmem:[%s865_s26 + $0x38] sm:$0xff] }
  0x1c   : > { %v340_v12 = vld [vmem:[%s865_s26 + $0x30] sm:$0xff]  ;;  %v339_v13 = vld [vmem:[%s865_s26 + $0x28] sm:$0xff]  ;;  %v338_v15 = vld [vmem:[%s865_s26 + $0x20] sm:$0xff] }
  0x1d   : > { %v337_v16 = vld [vmem:[%s865_s26 + $0x18] sm:$0xff]  ;;  %v336_v17 = vld [vmem:[%s865_s26 + $0x10] sm:$0xff]  ;;  %v335_v18 = vld [vmem:[%s865_s26 + $0x8] sm:$0xff] }
  0x1e   : > { %629 = vmatpush.xpose.msk.msra.mxu0 %vm357_vm0, %v348_v2  ;;  %v334_v19 = vld [vmem:[%s865_s26] sm:$0xff]  ;;  %v477_v40 = vld [vmem:[%s973_s5 + $0x8] sm:$0xff]  ;;  %s563_s26 = scalar_lea.hbm %s977_s9, %s834_s8 }
  0x1f   : > { %v430_v27 = vld [vmem:[%s971_s3] sm:$0xff]  ;;  %s567_s29 = sshll.u32 %s563_s26, 4  ;;  %s568_s29 = int_to_ptr.hbm [resolvable:$true] %s567_s29 }
  0x20   : > { %441 = vperm.xlu0 %692, %v433_v14   ;;  %v478_v29 = vld [vmem:[%s974_s6] sm:$0xff]  ;;  %s709_s10 = sshra.s32 %s568_s29, 4  ;;  %s710_s10 = int_to_ptr.hbm [resolvable:$true] %s709_s10 }
  0x21   : > { %487 = vperm.xlu1 %693, %v479_v22   ;;  %482 = vperm.xlu2 %694, %v478_v29   ;;  %v523_v30 = vld [vmem:[#allocation2] sm:$0x1]  ;;  %s711_s15 = scalar_lea.hbm %s710_s10, 1  ;;  %p716_p0 = scmp.lt.s32.totalorder %s710_s10, %s977_s9 }
  0x22   : > { %630 = vmatpush.xpose.msk.msra.mxu0 %vm357_vm0, %v347_v3  ;;  %v476_v39 = vld [vmem:[%s973_s5] sm:$0xff]  ;;  %p712_p11 = scmp.ne.s32.totalorder %s710_s10, %s711_s15  ;;  %p717_p1 = scmp.lt.s32.totalorder %s715_s18, %s711_s15 }
  0x23   : > { %v522_v49 = vld [vmem:[%s975_s7] sm:$0x1] }
  0x24   : > { %p713_p12 = pnand %p712_p11, %p851_p5  ;;  %p718_p2 = por %p717_p1, %p716_p0 }
  0x26   : > { %631 = vmatpush.xpose.msk.msra.mxu0 %vm357_vm0, %v346_v4  ;;  %p714_p13 = pneg %p713_p12 }
  0x28   : > { %p719_p3 = pnand %p718_p2, %p714_p13 }
  0x29   : > { %526 = vperm.xlu2 %694, %v523_v30  }
  0x2a   : > { %632 = vmatpush.xpose.msk.msra.mxu0 %vm357_vm0, %v345_v5 }
  0x2e   : > { %633 = vmatpush.xpose.msk.msra.mxu0 %vm357_vm0, %v344_v6 }
  0x32   : > { %634 = vmatpush.xpose.msk.msra.mxu0 %vm357_vm0, %v343_v7 }
  0x36   : > { %635 = vmatpush.xpose.msk.msra.mxu0 %vm357_vm0, %v342_v8 }
  0x3a   : > { %636 = vmatpush.xpose.msk.msra.mxu0 %vm357_vm0, %v341_v9 }
  0x3e   : > { %637 = vmatpush.xpose.msk.msra.mxu0 %vm357_vm0, %v340_v12 }
  0x42   : > { %638 = vmatpush.xpose.msk.msra.mxu0 %vm357_vm0, %v339_v13 }
  0x46   : > { %639 = vmatpush.xpose.msk.msra.mxu0 %vm357_vm0, %v338_v15 }
  0x4a   : > { %640 = vmatpush.xpose.msk.msra.mxu0 %vm357_vm0, %v337_v16 }
  0x4e   : > { %641 = vmatpush.xpose.msk.msra.mxu0 %vm357_vm0, %v336_v17 }
  0x52   : > { %642 = vmatpush.xpose.msk.msra.mxu0 %vm357_vm0, %v335_v18 }
  0x56   : > { %643 = vmatpush.xpose.msk.msra.mxu0 %vm357_vm0, %v334_v19 }
  0x59   : > { %644 = vmatmul.msk.f32.vlgmr.msra.gmra.mxu0 %vm357_vm0, %v350_v20 }
  0x7b   : > { %v483_v42 = vpop.permute.xlu2 %482 }
  0x83   : > { %v527_v50 = vpop.permute.xlu2 %526 }
  0x84   : > { %v529_v51 = vperm.slane %v527_v50, 0 }
  0x8a   : > { %v355_v23 = vpop.permute.xlu0 %354 }
  0x8b   : > { %v437_v32 = vpop.permute.xlu1 %436 }
  0x92   : > { %v442_v33 = vpop.permute.xlu0 %441 }
  0x93   : > { %v488_v43 = vpop.permute.xlu1 %487 }
  0xd6   : > { %v426_v24 = vpop.f32.mrf.mxu0 }
  0xd7   : > { %v427_v25 = vadd.f32 %v426_v24, %v355_v23 }
  0xd9   : > { %v429_v26 = vmax.f32 %v427_v25, 0.0 }
  0xdb   : > { %466 = vmatpush.msra.mxu1 %v429_v26 }
  0xdc   : > { %645 = vmatmul.msk.f32.vlgmr.msra.gmra.mxu1 %vm444_vm1, %v430_v27 }
  0xe4   : > { %646 = vmatmul.msk.f32.gmra.mxu1 %vm444_vm1, %v431_v28 }
 0x159   : > { %v468_v31 = vpop.f32.mrf.mxu1 }
 0x15a   : > { %v469_v35 = vadd.f32 %v468_v31, %v437_v32 }
 0x15c   : > { %v474_v38 = vmax.f32 %v469_v35, 0.0 }
 0x161   : > { %v471_v34 = vpop.f32.mrf.mxu1 }
 0x162   : > { %v472_v36 = vadd.f32 %v471_v34, %v442_v33 }
 0x164   : > { %v475_v37 = vmax.f32 %v472_v36, 0.0 }
 0x166   : > { %511 = vmatpush.msra.mxu2 %v475_v37 }
 0x168   : > { %512 = vmatpush.msra.mxu2 %v474_v38 }
 0x169   : > { %647 = vmatmul.msk.f32.vlgmr.msra.gmra.mxu2 %vm490_vm2, %v476_v39 }
 0x171   : > { %648 = vmatmul.msk.f32.gmra.mxu2 %vm490_vm2, %v477_v40 }
 0x1ec   : > { %v514_v41 = vpop.f32.mrf.mxu2 }
 0x1ed   : > { %v515_v45 = vadd.f32 %v514_v41, %v483_v42 }
 0x1ef   : > { %v520_v48 = vmax.f32 %v515_v45, 0.0 }
 0x1f4   : > { %v517_v44 = vpop.f32.mrf.mxu2 }
 0x1f5   : > { %v518_v46 = vadd.f32 %v517_v44, %v488_v43 }
 0x1f7   : > { %v521_v47 = vmax.f32 %v518_v46, 0.0 }
 0x1f9   : > { %547 = vmatpush.msra.mxu3 %v521_v47 }
 0x1fb   : > { %548 = vmatpush.msra.mxu3 %v520_v48 }
 0x1fc   : > { %649 = vmatmul.msk.f32.vlgmr.msra.gmra.mxu3 %vm490_vm2, %v522_v49 }
 0x27f   : > { %v550_v52 = vpop.f32.mrf.mxu3 }
 0x280   : > { %v551_v53 = vadd.f32 %v550_v52, %v529_v51 }
 0x282   : > { %553 = vst [vmem:[%s327_s27] sm:$0x1] %v551_v53 }
 0x283   : > { %722 = shalt.err (!%p719_p3)
}
 0x284   : > { %652 = dma.vmem_to_hbm [thread:$0]  (%p851_p5), %s566_s28, 16, %s568_s29, %s555_s30  }
 0x285 PF: > { %p658_p4 = scmp.ge.s32.totalorder %s757_s14, 2  ;;  %s579_s23 = sand.u32 1, %s745_s11  }
 0x286   : > { %s580_s25 = scalar_lea.sflag [#allocation4], %s579_s23 }
 0x287   : > { %p655_p7 = pnand %p658_p4, %p855_p6 }
 0x289   : > { %p656_p8 = pneg %p655_p7 }
 0x28b   : > { %740 = dma.done.wait (%p656_p8), %s580_s25, 16  }
 0x28c   : > { %742 = vsyncadd (%p656_p8), %s580_s25, 4294967280  ;;  %p21_p9 = scmp.ge.s32.totalorder %s838_s16, 10   ;;  %s980_s11 = smov %s749_s12 }
 0x28d   : > { %s981_s12 = smov %s753_s13  ;;  %s982_s13 = smov %s849_s19 }
 0x28e   : > { %s983_s14 = smov %s838_s16  ;;  %23 = sbr.rel (!%p21_p9) target bundleno = 6 (0x6), region = 91 }
 0x293   :  { %585 = vsyncpa [#allocation4], 1 }
 0x294   :  { %587 = vsyncpa [#allocation4 + $0x1], 1 }

</bundles_post_ra>
